<compile_context>
chip_gen: v6e
topology: v6e:2x2x1
jax: 0.10.0
libtpu: 0.0.40
codegen_flags: <defaults>
</compile_context>

<pallas_src>
import functools

import jax
import jax.numpy as jnp
from jax.experimental import pallas as pl
from jax.experimental.pallas import tpu as pltpu

_TARGET_BLOCK_BYTES = 2 << 20  # ~2 MiB per VMEM buffer: safe on v5e/v6e/v7x-per-core


def _hsigmoid_kernel(x_ref, o_ref):
    x = x_ref[...]
    if not jnp.issubdtype(x_ref.dtype, jnp.floating):
        # Fused promotion for integer/bool inputs (PyTorch true-division semantics).
        x = x.astype(jnp.float32)
    # h_sigmoid(x) = relu6(x + 3) / 6   (matches the PyTorch module exactly)
    y = jnp.clip(x + 3.0, 0.0, 6.0) / 6.0
    o_ref[...] = y.astype(o_ref.dtype)


@functools.lru_cache(maxsize=None)
def _use_core_parallel() -> bool:
    """True on chips with 2 TensorCores (v7x), where CORE_PARALLEL splits the grid."""
    if getattr(pltpu, "CORE_PARALLEL", None) is None:
        return False
    try:
        kind = jax.devices()[0].device_kind.lower()
    except Exception:
        return False
    return "v7" in kind


def _launch(x_arr, out_dtype, block_shape, grid):
    """Single pallas_call launch of the h_sigmoid kernel over `x_arr`."""
    if len(block_shape) == 2:
        index_map = lambda i: (i, 0)
    else:
        index_map = lambda i: (i,)

    def build(dim_sem):
        return pl.pallas_call(
            _hsigmoid_kernel,
            out_shape=jax.ShapeDtypeStruct(x_arr.shape, out_dtype),
            grid_spec=pltpu.PrefetchScalarGridSpec(
                num_scalar_prefetch=0,
                grid=grid,
                in_specs=[pl.BlockSpec(block_shape, index_map)],
                out_specs=pl.BlockSpec(block_shape, index_map),
            ),
            compiler_params=pltpu.CompilerParams(dimension_semantics=dim_sem),
        )

    semantics = []
    if _use_core_parallel() and grid[0] >= 2:
        # v7x: stream from both TensorCores (each has its own DMA path to HBM).
        semantics.append((pltpu.CORE_PARALLEL,))
    semantics.append(("parallel",))

    err = None
    for dim_sem in semantics:
        try:
            return build(dim_sem)(x_arr)
        except Exception as e:  # pragma: no cover - fallback if CORE_PARALLEL rejected
            err = e
    raise err


def h_sigmoid(x: jax.Array) -> jax.Array:
    """Elementwise h_sigmoid = relu6(x + 3) / 6 on a tensor of any shape."""
    orig_shape = x.shape
    in_dtype = x.dtype
    # Float dtypes are preserved; ints/bools produce float32 (true division).
    out_dtype = in_dtype if jnp.issubdtype(in_dtype, jnp.floating) else jnp.float32

    n = 1
    for d in orig_shape:
        n *= int(d)
    if n == 0:
        return jnp.zeros(orig_shape, out_dtype)

    in_bytes = jnp.dtype(in_dtype).itemsize
    out_bytes = jnp.dtype(out_dtype).itemsize
    max_bytes = max(in_bytes, out_bytes)

    flat = x.reshape(-1)

    if n % 128 == 0:
        # Lane-dense 2-D slab; widest lane width that divides n exactly.
        lane_w = 128
        for w in (1024, 512, 256):
            if n % w == 0:
                lane_w = w
                break
        rows = n // lane_w

        # Sublane packing granularity of the (narrow) input dtype:
        # 8 rows for 4-byte, 16 for 2-byte, 32 for 1-byte elements.
        sublanes = max(8, 32 // max(1, in_bytes))
        block_rows = max(
            sublanes,
            (_TARGET_BLOCK_BYTES // (lane_w * max_bytes)) // sublanes * sublanes,
        )
        if rows <= block_rows:
            block_rows = rows  # whole-dimension block is always legal

        x2d = flat.reshape(rows, lane_w)
        # Partial last block along rows is masked by Pallas -> no padding DMA'd.
        grid = (pl.cdiv(rows, block_rows),)
        out = _launch(x2d, out_dtype, (block_rows, lane_w), grid)
        return out.reshape(orig_shape)

    # Ragged total size (n % 128 != 0): never pad/slice the whole tensor.
    if n * max_bytes <= (1 << 20):
        # Small: one full-array (1, n) block (full-dim blocks are always legal).
        x2d = flat.reshape(1, n)
        out = _launch(x2d, out_dtype, (1, n), (1,))
        return out.reshape(orig_shape)

    # Large ragged: 1-D tiles, Pallas masks the partial last block.
    block_elems = max(1024, (_TARGET_BLOCK_BYTES // max_bytes) // 1024 * 1024)
    out = _launch(flat, out_dtype, (block_elems,), (pl.cdiv(n, block_elems),))
    return out.reshape(orig_shape)


def _h_sigmoid_ref(x):
    # Pure-JAX reference mirroring the PyTorch module.
    if not jnp.issubdtype(x.dtype, jnp.floating):
        x = x.astype(jnp.float32)
    return jnp.clip(x + 3.0, 0.0, 6.0) / 6.0


if __name__ == "__main__":
    key = jax.random.PRNGKey(0)
    k1, k2, k3, k4 = jax.random.split(key, 4)

    # Main case: NCHW activation, f32, 128-aligned element count (2*4*16*16 = 2048).
    x = jax.random.normal(k1, (2, 4, 16, 16), dtype=jnp.float32) * 4.0
    y = jax.block_until_ready(h_sigmoid(x))
    assert y.shape == x.shape and y.dtype == x.dtype
    assert jnp.allclose(y, _h_sigmoid_ref(x), atol=1e-6, rtol=1e-6)

    # Ragged element count (3*5*7 = 105): single full-array block, no padding pass.
    xr = jax.random.normal(k2, (3, 5, 7), dtype=jnp.float32) * 4.0
    yr = jax.block_until_ready(h_sigmoid(xr))
    assert yr.shape == xr.shape and yr.dtype == xr.dtype
    assert jnp.allclose(yr, _h_sigmoid_ref(xr), atol=1e-6, rtol=1e-6)

    # bf16 stays bf16 (low-precision math, like PyTorch under half precision).
    xb = (jax.random.normal(k3, (2, 4, 16, 16), dtype=jnp.float32) * 4.0).astype(jnp.bfloat16)
    yb = jax.block_until_ready(h_sigmoid(xb))
    assert yb.shape == xb.shape and yb.dtype == jnp.bfloat16
    assert jnp.allclose(yb.astype(jnp.float32), _h_sigmoid_ref(xb).astype(jnp.float32),
                        atol=2e-2, rtol=2e-2)

    # Integer input -> float32 output; the cast is fused inside the kernel.
    xi = jax.random.randint(k4, (4, 33), -8, 8, dtype=jnp.int32)
    yi = jax.block_until_ready(h_sigmoid(xi))
    assert yi.shape == xi.shape and yi.dtype == jnp.float32
    assert jnp.allclose(yi, _h_sigmoid_ref(xi), atol=1e-6, rtol=1e-6)

    print("KERNEL_OK")
</pallas_src>

<mosaic_0001>
module attributes {stable_mosaic.version = 11 : i64} {
  func.func @_hsigmoid_kernel(%arg0: i32, %arg1: memref<2x1024xf32, #tpu.memory_space<vmem>>, %arg2: memref<2x1024xf32, #tpu.memory_space<vmem>>) attributes {dimension_semantics = [#tpu.dimension_semantics<parallel>], iteration_bounds = array<i64: 1>, scalar_prefetch = 0 : i64, scratch_operands = 0 : i64, tpu.core_type = #tpu.core_type<tc>, window_params = [{transform_indices = @transform_0, window_bounds = array<i64: 2, 1024>}, {transform_indices = @transform_1, window_bounds = array<i64: 2, 1024>}]} {
    %c0 = arith.constant 0 : index
    %c0_0 = arith.constant 0 : index
    %0 = vector.load %arg1[%c0, %c0_0] : memref<2x1024xf32, #tpu.memory_space<vmem>>, vector<2x1024xf32>
    %cst = arith.constant 3.000000e+00 : f32
    %1 = vector.broadcast %cst : f32 to vector<2x1024xf32>
    %2 = arith.addf %0, %1 : vector<2x1024xf32>
    %cst_1 = arith.constant 0.000000e+00 : f32
    %cst_2 = arith.constant 6.000000e+00 : f32
    %3 = vector.broadcast %cst_1 : f32 to vector<2x1024xf32>
    %4 = arith.maximumf %3, %2 : vector<2x1024xf32>
    %5 = vector.broadcast %cst_2 : f32 to vector<2x1024xf32>
    %6 = arith.minimumf %5, %4 : vector<2x1024xf32>
    %cst_3 = arith.constant 6.000000e+00 : f32
    %7 = vector.broadcast %cst_3 : f32 to vector<2x1024xf32>
    %8 = arith.divf %6, %7 : vector<2x1024xf32>
    %c0_4 = arith.constant 0 : index
    %c0_5 = arith.constant 0 : index
    %9 = vector.load %arg2[%c0_4, %c0_5] : memref<2x1024xf32, #tpu.memory_space<vmem>>, vector<2x1024xf32>
    tpu.vector_store %arg2[%c0_4, %c0_5], %8 {strides = array<i32>} : memref<2x1024xf32, #tpu.memory_space<vmem>>, vector<2x1024xf32>,
    return
  }
  func.func @transform_0(%arg0: i32) -> (i32, i32) {
    %c0_i32 = arith.constant 0 : i32
    %c0_i32_0 = arith.constant 0 : i32
    return %arg0, %c0_i32 : i32, i32
  }
  func.func @transform_1(%arg0: i32) -> (i32, i32) {
    %c0_i32 = arith.constant 0 : i32
    %c0_i32_0 = arith.constant 0 : i32
    return %arg0, %c0_i32 : i32, i32
  }
}

</mosaic_0001>

<bundles_post_ra>
// kernel: tpu_custom_call.1
= control target key start
LH: loop header
LB: loop body
LE: loop exit
PB: predicated region body
PF: predicated region fallthrough
CT: control target
= control target key end

     0   :  { %6 = vsyncpa [#allocation3], 0  ;;  %s113_s0 = inlined_call_operand.hbm [shape: f32[2,1024], index: 0, kind: input, shape index: {}]   ;;  %s114_s1 = inlined_call_operand.hbm [shape: f32[2,1024], index: 1, kind: output, shape index: {}]  }
   0x1   :  { %7 = vsyncpa [#allocation4], 0  ;;  %s95_s6 = smov [#allocation2]  }
   0x2   :  { %s14_s7 = sshll.u32 %s95_s6, 4  ;;  %s15_s7 = int_to_ptr.vmem [resolvable:$true] %s14_s7 }
   0x3   :  { %s59_s8 = scalar_lea.vmem %s15_s7, 256  ;;  %p64_p1 = scmp.lt.s32.totalorder %s15_s7, %s15_s7 }
   0x4   :  { %p60_p0 = scmp.ne.s32.totalorder %s15_s7, %s59_s8  ;;  %p65_p2 = scmp.lt.s32.totalorder %s59_s8, %s59_s8 }
   0x6   :  { %p66_p3 = por %p65_p2, %p64_p1 }
   0x8   :  { %p67_p4 = pnand %p66_p3, %p60_p0 }
   0xa   :  { %70 = shalt.err (!%p67_p4)
}
   0xb   :  { %17 = dma.hbm_to_vmem [thread:$0]  %s113_s0, 256, %s15_s7, [#allocation3]  }
   0xc   :  { %91 = dma.done.wait [#allocation3], 256  }
   0xd   :  { %92 = vsyncadd [#allocation3], 4294967040  ;;  %v21_v0 = vld [vmem:[#allocation2] sm:$0xff]  ;;  %v22_v1 = vld [vmem:[#allocation2 + $0x8] sm:$0xff]  ;;  %s96_s11 = smov [#allocation5]  }
   0xe   :  { %v23_v2 = vadd.f32 3.0, %v21_v0  ;;  %v24_v3 = vadd.f32 3.0, %v22_v1  ;;  %s40_s12 = sshll.u32 %s96_s11, 4  ;;  %s41_s12 = int_to_ptr.vmem [resolvable:$true] %s40_s12 }
   0xf   :  { %s71_s13 = scalar_lea.vmem %s41_s12, 256  ;;  %p76_p6 = scmp.lt.s32.totalorder %s41_s12, %s41_s12 }
  0x10   :  { %v25_v4 = vmax.f32 %v23_v2, 0.0  ;;  %v26_v5 = vmax.f32 %v24_v3, 0.0  ;;  %p72_p5 = scmp.ne.s32.totalorder %s41_s12, %s71_s13  ;;  %p77_p7 = scmp.lt.s32.totalorder %s71_s13, %s71_s13 }
  0x12   :  { %v27_v6 = vmin.f32 %v25_v4, 6.0  ;;  %v28_v7 = vmin.f32 %v26_v5, 6.0  ;;  %p78_p8 = por %p77_p7, %p76_p6 }
  0x14   :  { %v30_v8 = vmul.f32 0.16666667, %v27_v6  ;;  %v31_v9 = vmul.f32 0.16666667, %v28_v7  ;;  %p79_p9 = pnand %p78_p8, %p72_p5 }
  0x16   :  { %32 = vst [vmem:[#allocation5] sm:$0xff] %v30_v8  ;;  %33 = vst [vmem:[#allocation5 + $0x8] sm:$0xff] %v31_v9 }
  0x17   :  { %82 = shalt.err (!%p79_p9)
}
  0x18   :  { %43 = dma.vmem_to_hbm [thread:$0]  %s41_s12, 256, %s114_s1, [#allocation4]  }
  0x19   :  { %93 = dma.done.wait [#allocation4], 256  }
  0x1a   :  { %94 = vsyncadd [#allocation4], 4294967040 }
  0x1b   :  { %47 = vsyncpa [#allocation3], 1 }
  0x1c   :  { %48 = vsyncpa [#allocation4], 1 }

</bundles_post_ra>
